<compile_context>
chip_gen: v5e
topology: v5e:2x2
jax: 0.10.0
libtpu: 0.0.40
codegen_flags: <defaults>
</compile_context>

<pallas_src>
import numpy as np
import jax
import jax.numpy as jnp
from jax.experimental import pallas as pl
from jax.experimental.pallas import tpu as pltpu

_EPS = 1e-5          # BatchNorm1d default eps
_NEG = -1e30         # stand-in for -inf pool padding (safe: ELU output >= -1)


def _pick_batch_block(B, per_batch_bytes, budget_bytes=6 << 20, cap=16):
    """Largest divisor of B (<= cap) whose moving blocks fit the VMEM budget."""
    tb = 1
    for d in range(1, min(B, cap) + 1):
        if B % d == 0 and d * per_batch_bytes <= budget_bytes:
            tb = d
    return tb


def conv_layer_forward(x, w, b, gamma, beta,
                       matmul_dtype=jnp.bfloat16,
                       conv_store_dtype=jnp.bfloat16):
    """x: (B, L, C) f32.  w: (C, C, 3) PyTorch Conv1d weight layout.
    Returns (B, Lo, C), Lo = (L+1)//2 + 1 (matches the torch module)."""
    B, L, C = x.shape
    Lp = L + 4                       # circular pad 2 on each side
    Lc = L + 2                       # Conv1d(k=3, pad=2) output length
    Lo = (Lc - 1) // 2 + 1           # MaxPool1d(k=3, stride=2, pad=1)

    # --- wrapper glue: circular pad along seq; weights to (3C, C), k-major ---
    xp = jnp.concatenate([x[:, -2:, :], x, x[:, :2, :]], axis=1)      # (B, Lp, C)
    wt = jnp.transpose(w, (2, 1, 0)).reshape(3 * C, C)                # (3C, C)
    if matmul_dtype is not None:
        xp = xp.astype(matmul_dtype)     # cast once -> halves input HBM traffic
        wt = wt.astype(matmul_dtype)     # hoisted weight cast (not per grid step)
    b2 = b.reshape(1, C).astype(jnp.float32)

    in_bytes = jnp.dtype(xp.dtype).itemsize
    st_bytes = jnp.dtype(conv_store_dtype).itemsize

    # per-batch moving bytes (x2 for double-buffering on the batch-indexed blocks)
    p1_bytes = 2 * (Lp * C * in_bytes + Lc * C * st_bytes) + Lc * 3 * C * in_bytes
    p2_bytes = 2 * (Lc * C * st_bytes + Lo * C * 4) + Lc * C * 4
    TB = _pick_batch_block(B, max(p1_bytes, p2_bytes))
    nb = B // TB

    # ---------- pass 1: fused K=3C conv matmul + per-block BN partial stats ----------
    def conv_stats_kernel(xp_ref, wt_ref, b_ref, conv_ref, stats_ref):
        wk = wt_ref[...]                              # (3C, C) in matmul dtype
        bias = b_ref[...]                             # (1, C) f32
        s1 = jnp.zeros((1, C), jnp.float32)
        s2 = jnp.zeros((1, C), jnp.float32)
        for tb in range(TB):                          # static, unrolled
            taps = jnp.concatenate(
                [xp_ref[tb, pl.ds(k, Lc), :] for k in range(3)], axis=1)  # (Lc, 3C)
            conv = jnp.dot(taps, wk, preferred_element_type=jnp.float32) + bias
            conv_ref[tb] = conv.astype(conv_store_dtype)
            s1 = s1 + jnp.sum(conv, axis=0, keepdims=True)       # stats from f32 conv
            s2 = s2 + jnp.sum(conv * conv, axis=0, keepdims=True)
        stats_ref[...] = jnp.concatenate([s1, s2], axis=0)       # (2, C) partials

    conv_out, stats_parts = pl.pallas_call(
        conv_stats_kernel,
        grid=(nb,),
        in_specs=[
            pl.BlockSpec((TB, Lp, C), lambda i: (i, 0, 0)),
            pl.BlockSpec((3 * C, C), lambda i: (0, 0)),
            pl.BlockSpec((1, C), lambda i: (0, 0)),
        ],
        out_specs=(
            pl.BlockSpec((TB, Lc, C), lambda i: (i, 0, 0)),
            pl.BlockSpec((None, 2, C), lambda i: (i, 0, 0)),     # per-block partials
        ),
        out_shape=(
            jax.ShapeDtypeStruct((B, Lc, C), conv_store_dtype),
            jax.ShapeDtypeStruct((nb, 2, C), jnp.float32),
        ),
        compiler_params=pltpu.CompilerParams(
            dimension_semantics=("parallel",),         # no resident accumulator
            vmem_limit_bytes=32 * 1024 * 1024),
        cost_estimate=pl.CostEstimate(
            flops=2 * B * Lc * 3 * C * C,
            transcendentals=0,
            bytes_accessed=(in_bytes * (B * Lp * C + 3 * C * C)
                            + st_bytes * B * Lc * C
                            + 4 * (nb * 2 * C + C))),
    )(xp, wt, b2)

    # wrapper-side reduction of the tiny per-block partials -> BN scale/shift
    n = float(B * Lc)
    stats = jnp.sum(stats_parts, axis=0)                         # (2, C)
    mean = stats[0] / n
    var = jnp.maximum(stats[1] / n - mean * mean, 0.0)
    inv = jax.lax.rsqrt(var + _EPS)
    scale = (gamma * inv).reshape(1, C).astype(jnp.float32)
    shift = (beta - mean * gamma * inv).reshape(1, C).astype(jnp.float32)

    # ---------- pass 2: BatchNorm (batch stats) + ELU + MaxPool(3, 2, 1) ----------
    def bn_elu_pool_kernel(conv_ref, scale_ref, shift_ref, out_ref, m_ref):
        sc = scale_ref[...]
        sh = shift_ref[...]
        neg = jnp.full((1, C), _NEG, jnp.float32)                # hoisted pad row
        for tb in range(TB):                          # static, unrolled
            y = conv_ref[tb].astype(jnp.float32) * sc + sh       # (Lc, C), f32 math
            # ELU(alpha=1); clamp the exp arg so the dead branch can't overflow.
            y = jnp.where(y > 0, y, jnp.exp(jnp.minimum(y, 0.0)) - 1.0)
            # MaxPool1d(3, 2, 1): out[j] = max(y[2j-1], y[2j], y[2j+1]).
            y_m1 = jnp.concatenate([neg, y[:Lc - 1, :]], axis=0)  # y[p-1] at row p
            y_p1 = jnp.concatenate([y[1:, :], neg], axis=0)       # y[p+1] at row p
            m_ref[...] = jnp.maximum(jnp.maximum(y_m1, y), y_p1)  # aligned full store
            out_ref[tb] = m_ref[pl.ds(0, Lo, stride=2), :]        # one strided read

    out = pl.pallas_call(
        bn_elu_pool_kernel,
        grid=(nb,),
        in_specs=[
            pl.BlockSpec((TB, Lc, C), lambda i: (i, 0, 0)),
            pl.BlockSpec((1, C), lambda i: (0, 0)),
            pl.BlockSpec((1, C), lambda i: (0, 0)),
        ],
        out_specs=pl.BlockSpec((TB, Lo, C), lambda i: (i, 0, 0)),
        out_shape=jax.ShapeDtypeStruct((B, Lo, C), jnp.float32),
        scratch_shapes=[pltpu.VMEM((Lc, C), jnp.float32)],
        compiler_params=pltpu.CompilerParams(
            dimension_semantics=("parallel",),                   # megacore split
            vmem_limit_bytes=32 * 1024 * 1024),
        cost_estimate=pl.CostEstimate(
            flops=10 * B * Lc * C,
            transcendentals=B * Lc * C,
            bytes_accessed=(st_bytes * B * Lc * C + 4 * B * Lo * C + 8 * C)),
    )(conv_out, scale, shift)

    return out                                                    # (B, Lo, C)


def _reference(x, w, b, gamma, beta):
    """Pure-JAX reference of the PyTorch forward (training-mode BatchNorm)."""
    B, L, C = x.shape
    Lc = L + 2
    Lo = (Lc - 1) // 2 + 1
    xc = jnp.transpose(x, (0, 2, 1))                                  # (B, C, L)
    xp = jnp.concatenate([xc[:, :, -2:], xc, xc[:, :, :2]], axis=2)   # (B, C, L+4)
    conv = b[None, :, None]
    for k in range(3):
        conv = conv + jnp.einsum('oi,bil->bol', w[:, :, k], xp[:, :, k:k + Lc])
    mean = conv.mean(axis=(0, 2), keepdims=True)
    var = ((conv - mean) ** 2).mean(axis=(0, 2), keepdims=True)
    y = (conv - mean) / jnp.sqrt(var + _EPS)
    y = y * gamma[None, :, None] + beta[None, :, None]
    y = jnp.where(y > 0, y, jnp.exp(jnp.minimum(y, 0.0)) - 1.0)
    ypad = jnp.pad(y, ((0, 0), (0, 0), (1, 1)), constant_values=-jnp.inf)
    pooled = jnp.stack([ypad[:, :, 2 * j:2 * j + 3].max(axis=2)
                        for j in range(Lo)], axis=2)
    return jnp.transpose(pooled, (0, 2, 1))                           # (B, Lo, C)


if __name__ == "__main__":
    B, L, C = 2, 16, 8   # x: (batch, seq_len, c_in)
    key = jax.random.PRNGKey(0)
    kx, kw, kb = jax.random.split(key, 3)
    x = jax.random.normal(kx, (B, L, C), dtype=jnp.float32)

    # deterministic parameter init (Conv1d-style uniform; BatchNorm defaults)
    bound = 1.0 / np.sqrt(C * 3)
    w = jax.random.uniform(kw, (C, C, 3), jnp.float32, -bound, bound)
    b = jax.random.uniform(kb, (C,), jnp.float32, -bound, bound)
    gamma = jnp.ones((C,), jnp.float32)
    beta = jnp.zeros((C,), jnp.float32)

    ref = _reference(x, w, b, gamma, beta)

    # f32 path: tight tolerance (bit-for-bit same math as the module forward)
    out32 = jax.block_until_ready(
        conv_layer_forward(x, w, b, gamma, beta,
                           matmul_dtype=None, conv_store_dtype=jnp.float32))
    assert out32.shape == (B, (L + 1) // 2 + 1, C), out32.shape
    np.testing.assert_allclose(np.asarray(out32), np.asarray(ref),
                               rtol=1e-4, atol=1e-5)

    # default performance path: bf16 MXU + bf16 conv intermediate (relaxed tol)
    out16 = jax.block_until_ready(conv_layer_forward(x, w, b, gamma, beta))
    assert out16.shape == out32.shape, out16.shape
    np.testing.assert_allclose(np.asarray(out16), np.asarray(ref),
                               rtol=3e-2, atol=3e-2)

    print("KERNEL_OK")
</pallas_src>

<mosaic_0001>
module attributes {stable_mosaic.version = 11 : i64} {
  func.func @conv_stats_kernel(%arg0: i32, %arg1: memref<2x20x8xf32, #tpu.memory_space<vmem>>, %arg2: memref<24x8xf32, #tpu.memory_space<vmem>>, %arg3: memref<1x8xf32, #tpu.memory_space<vmem>>, %arg4: memref<2x18x8xf32, #tpu.memory_space<vmem>>, %arg5: memref<1x2x8xf32, #tpu.memory_space<vmem>>) attributes {dimension_semantics = [#tpu.dimension_semantics<parallel>], iteration_bounds = array<i64: 1>, scalar_prefetch = 0 : i64, scratch_operands = 0 : i64, tpu.core_type = #tpu.core_type<tc>, window_params = [{transform_indices = @transform_0, window_bounds = array<i64: 2, 20, 8>}, {pipeline_mode = #tpu.pipeline_mode<synchronous>, transform_indices = @transform_1, window_bounds = array<i64: 24, 8>}, {pipeline_mode = #tpu.pipeline_mode<synchronous>, transform_indices = @transform_2, window_bounds = array<i64: 1, 8>}, {transform_indices = @transform_3, window_bounds = array<i64: 2, 18, 8>}, {transform_indices = @transform_4, window_bounds = array<i64: 1, 2, 8>}]} {
    %c0 = arith.constant 0 : index
    %c0_0 = arith.constant 0 : index
    %0 = vector.load %arg2[%c0, %c0_0] : memref<24x8xf32, #tpu.memory_space<vmem>>, vector<24x8xf32>
    %c0_1 = arith.constant 0 : index
    %c0_2 = arith.constant 0 : index
    %1 = vector.load %arg3[%c0_1, %c0_2] : memref<1x8xf32, #tpu.memory_space<vmem>>, vector<1x8xf32>
    %cst = arith.constant 0.000000e+00 : f32
    %2 = vector.broadcast %cst : f32 to vector<1x8xf32>
    %cst_3 = arith.constant 0.000000e+00 : f32
    %3 = vector.broadcast %cst_3 : f32 to vector<1x8xf32>
    %c0_4 = arith.constant 0 : index
    %c0_5 = arith.constant 0 : index
    %c0_6 = arith.constant 0 : index
    %4 = vector.load %arg1[%c0_4, %c0_5, %c0_6] : memref<2x20x8xf32, #tpu.memory_space<vmem>>, vector<1x18x8xf32>
    %5 = vector.shape_cast %4 : vector<1x18x8xf32> to vector<18x8xf32>
    %c0_7 = arith.constant 0 : index
    %c1 = arith.constant 1 : index
    %c0_8 = arith.constant 0 : index
    %6 = vector.load %arg1[%c0_7, %c1, %c0_8] : memref<2x20x8xf32, #tpu.memory_space<vmem>>, vector<1x18x8xf32>
    %7 = vector.shape_cast %6 : vector<1x18x8xf32> to vector<18x8xf32>
    %c0_9 = arith.constant 0 : index
    %c2 = arith.constant 2 : index
    %c0_10 = arith.constant 0 : index
    %8 = vector.load %arg1[%c0_9, %c2, %c0_10] : memref<2x20x8xf32, #tpu.memory_space<vmem>>, vector<1x18x8xf32>
    %9 = vector.shape_cast %8 : vector<1x18x8xf32> to vector<18x8xf32>
    %10 = tpu.concatenate %5, %7, %9 in 1 : vector<18x8xf32>, vector<18x8xf32>, vector<18x8xf32> -> vector<18x24xf32>
    %cst_11 = arith.constant dense<0.000000e+00> : vector<18x8xf32>
    %11 = tpu.matmul %10, %0, %cst_11 {dimension_numbers = #tpu.dot_dimension_numbers<[1], [0], [0], [1], [0, 0, 1, 1], [], []>} : vector<18x24xf32>, vector<24x8xf32>, vector<18x8xf32> -> vector<18x8xf32>
    %12 = vector.broadcast %1 : vector<1x8xf32> to vector<18x8xf32>
    %13 = arith.addf %11, %12 : vector<18x8xf32>
    %c0_12 = arith.constant 0 : index
    %c0_13 = arith.constant 0 : index
    %c0_14 = arith.constant 0 : index
    %14 = vector.load %arg4[%c0_12, %c0_13, %c0_14] : memref<2x18x8xf32, #tpu.memory_space<vmem>>, vector<1x18x8xf32>
    %15 = vector.shape_cast %14 : vector<1x18x8xf32> to vector<18x8xf32>
    %16 = vector.shape_cast %13 : vector<18x8xf32> to vector<1x18x8xf32>
    tpu.vector_store %arg4[%c0_12, %c0_13, %c0_14], %16 {strides = array<i32>} : memref<2x18x8xf32, #tpu.memory_space<vmem>>, vector<1x18x8xf32>,
    %cst_15 = arith.constant dense<0.000000e+00> : vector<8xf32>
    %17 = vector.multi_reduction <add>, %13, %cst_15 [0] : vector<18x8xf32> to vector<8xf32>
    %18 = vector.shape_cast %17 : vector<8xf32> to vector<1x8xf32>
    %19 = arith.addf %2, %18 : vector<1x8xf32>
    %20 = arith.mulf %13, %13 : vector<18x8xf32>
    %cst_16 = arith.constant dense<0.000000e+00> : vector<8xf32>
    %21 = vector.multi_reduction <add>, %20, %cst_16 [0] : vector<18x8xf32> to vector<8xf32>
    %22 = vector.shape_cast %21 : vector<8xf32> to vector<1x8xf32>
    %23 = arith.addf %3, %22 : vector<1x8xf32>
    %c1_17 = arith.constant 1 : index
    %c0_18 = arith.constant 0 : index
    %c0_19 = arith.constant 0 : index
    %24 = vector.load %arg1[%c1_17, %c0_18, %c0_19] : memref<2x20x8xf32, #tpu.memory_space<vmem>>, vector<1x18x8xf32>
    %25 = vector.shape_cast %24 : vector<1x18x8xf32> to vector<18x8xf32>
    %c1_20 = arith.constant 1 : index
    %c1_21 = arith.constant 1 : index
    %c0_22 = arith.constant 0 : index
    %26 = vector.load %arg1[%c1_20, %c1_21, %c0_22] : memref<2x20x8xf32, #tpu.memory_space<vmem>>, vector<1x18x8xf32>
    %27 = vector.shape_cast %26 : vector<1x18x8xf32> to vector<18x8xf32>
    %c1_23 = arith.constant 1 : index
    %c2_24 = arith.constant 2 : index
    %c0_25 = arith.constant 0 : index
    %28 = vector.load %arg1[%c1_23, %c2_24, %c0_25] : memref<2x20x8xf32, #tpu.memory_space<vmem>>, vector<1x18x8xf32>
    %29 = vector.shape_cast %28 : vector<1x18x8xf32> to vector<18x8xf32>
    %30 = tpu.concatenate %25, %27, %29 in 1 : vector<18x8xf32>, vector<18x8xf32>, vector<18x8xf32> -> vector<18x24xf32>
    %cst_26 = arith.constant dense<0.000000e+00> : vector<18x8xf32>
    %31 = tpu.matmul %30, %0, %cst_26 {dimension_numbers = #tpu.dot_dimension_numbers<[1], [0], [0], [1], [0, 0, 1, 1], [], []>} : vector<18x24xf32>, vector<24x8xf32>, vector<18x8xf32> -> vector<18x8xf32>
    %32 = vector.broadcast %1 : vector<1x8xf32> to vector<18x8xf32>
    %33 = arith.addf %31, %32 : vector<18x8xf32>
    %c1_27 = arith.constant 1 : index
    %c0_28 = arith.constant 0 : index
    %c0_29 = arith.constant 0 : index
    %34 = vector.load %arg4[%c1_27, %c0_28, %c0_29] : memref<2x18x8xf32, #tpu.memory_space<vmem>>, vector<1x18x8xf32>
    %35 = vector.shape_cast %34 : vector<1x18x8xf32> to vector<18x8xf32>
    %36 = vector.shape_cast %33 : vector<18x8xf32> to vector<1x18x8xf32>
    tpu.vector_store %arg4[%c1_27, %c0_28, %c0_29], %36 {strides = array<i32>} : memref<2x18x8xf32, #tpu.memory_space<vmem>>, vector<1x18x8xf32>,
    %cst_30 = arith.constant dense<0.000000e+00> : vector<8xf32>
    %37 = vector.multi_reduction <add>, %33, %cst_30 [0] : vector<18x8xf32> to vector<8xf32>
    %38 = vector.shape_cast %37 : vector<8xf32> to vector<1x8xf32>
    %39 = arith.addf %19, %38 : vector<1x8xf32>
    %40 = arith.mulf %33, %33 : vector<18x8xf32>
    %cst_31 = arith.constant dense<0.000000e+00> : vector<8xf32>
    %41 = vector.multi_reduction <add>, %40, %cst_31 [0] : vector<18x8xf32> to vector<8xf32>
    %42 = vector.shape_cast %41 : vector<8xf32> to vector<1x8xf32>
    %43 = arith.addf %23, %42 : vector<1x8xf32>
    %44 = tpu.concatenate %39, %43 in 0 : vector<1x8xf32>, vector<1x8xf32> -> vector<2x8xf32>
    %c0_32 = arith.constant 0 : index
    %c0_33 = arith.constant 0 : index
    %c0_34 = arith.constant 0 : index
    %45 = vector.load %arg5[%c0_32, %c0_33, %c0_34] : memref<1x2x8xf32, #tpu.memory_space<vmem>>, vector<1x2x8xf32>
    %46 = vector.shape_cast %45 : vector<1x2x8xf32> to vector<2x8xf32>
    %47 = vector.shape_cast %44 : vector<2x8xf32> to vector<1x2x8xf32>
    tpu.vector_store %arg5[%c0_32, %c0_33, %c0_34], %47 {strides = array<i32>} : memref<1x2x8xf32, #tpu.memory_space<vmem>>, vector<1x2x8xf32>,
    return
  }
  func.func @transform_0(%arg0: i32) -> (i32, i32, i32) {
    %c0_i32 = arith.constant 0 : i32
    %c0_i32_0 = arith.constant 0 : i32
    %c0_i32_1 = arith.constant 0 : i32
    return %arg0, %c0_i32, %c0_i32_0 : i32, i32, i32
  }
  func.func @transform_1(%arg0: i32) -> (i32, i32) {
    %c0_i32 = arith.constant 0 : i32
    %c0_i32_0 = arith.constant 0 : i32
    %c0_i32_1 = arith.constant 0 : i32
    return %c0_i32, %c0_i32_0 : i32, i32
  }
  func.func @transform_2(%arg0: i32) -> (i32, i32) {
    %c0_i32 = arith.constant 0 : i32
    %c0_i32_0 = arith.constant 0 : i32
    %c0_i32_1 = arith.constant 0 : i32
    return %c0_i32, %c0_i32_0 : i32, i32
  }
  func.func @transform_3(%arg0: i32) -> (i32, i32, i32) {
    %c0_i32 = arith.constant 0 : i32
    %c0_i32_0 = arith.constant 0 : i32
    %c0_i32_1 = arith.constant 0 : i32
    return %arg0, %c0_i32, %c0_i32_0 : i32, i32, i32
  }
  func.func @transform_4(%arg0: i32) -> (i32, i32, i32) {
    %c0_i32 = arith.constant 0 : i32
    %c0_i32_0 = arith.constant 0 : i32
    %c0_i32_1 = arith.constant 0 : i32
    return %arg0, %c0_i32, %c0_i32_0 : i32, i32, i32
  }
}

</mosaic_0001>

<bundles_post_ra>
// kernel: tpu_custom_call.1
= control target key start
LH: loop header
LB: loop body
LE: loop exit
PB: predicated region body
PF: predicated region fallthrough
CT: control target
= control target key end

     0   :  { %s315_s19 = smov 16   ;;  %s316_s20 = smov 8   ;;  %s467_s0 = inlined_call_operand.vmem [shape: f32[2,20,8], index: 0, kind: input, shape index: {}]   ;;  %s468_s1 = inlined_call_operand.vmem [shape: f32[24,8], index: 1, kind: input, shape index: {}]   ;;  %s469_s2 = inlined_call_operand.vmem [shape: f32[1,8], index: 2, kind: input, shape index: {}]   ;;  %s470_s3 = inlined_call_operand.vmem [shape: f32[2,18,8], index: 3, kind: output, shape index: {0}]   ;;  %s471_s4 = inlined_call_operand.hbm [shape: f32[1,2,8], index: 4, kind: output, shape index: {1}]  }
   0x1   :  { %v28_v0 = vld [vmem:[%s467_s0 + $0xa] sm:$0xff] }
   0x2   :  { %v25_v1 = vld [vmem:[%s467_s0 + $0x9] sm:$0xff]  ;;  %47 = vrot.lane.b32.xlu1 %v28_v0, %s315_s19  ;;  %v26_v2 = vld [vmem:[%s467_s0 + $0x11] sm:$0x3] }
   0x3   :  { %35 = vrot.lane.b32.xlu0 %v25_v1, %s316_s20  ;;  %37 = vrot.lane.b32.xlu2 %v26_v2, %s316_s20  ;;  %v19_v3 = vld [vmem:[%s468_s1 + $0x10] sm:$0xff] }
   0x4   :  { %279 = vmatpush.msra.mxu2 %v19_v3  ;;  %282 = vmatpush.msra.mxu3 %v19_v3 }
   0x5   :  { %10 = vsyncpa [#allocation3], 0  ;;  %v271_v4 = vld [vmem:[%s467_s0 + $0x22] sm:$0xff]  ;;  %88 = vmatpush.msra.mxu0 %v19_v3  ;;  %194 = vmatpush.msra.mxu1 %v19_v3  ;;  %v272_v7 = vld [vmem:[%s467_s0 + $0x2a] sm:$0x3]  ;;  %vm54_vm0 = vcmask 64512  }
   0x6   :  { %v268_v5 = vld [vmem:[%s467_s0 + $0x21] sm:$0xff]  ;;  %v269_v6 = vld [vmem:[%s467_s0 + $0x29] sm:$0x3]  ;;  %v29_v8 = vld [vmem:[%s467_s0 + $0x12] sm:$0x3]  ;;  %vm58_vm1 = vcmask 130048  }
   0x7   :  { %v24_v9 = vld [vmem:[%s467_s0 + $0x1] sm:$0xff]  ;;  %v267_v11 = vld [vmem:[%s467_s0 + $0x19] sm:$0xff]  ;;  %vm65_vm2 = vcmask 195584   ;;  %v23_v27 = vld [vmem:[%s467_s0 + $0x10] sm:$0x3]  ;;  %vm103_vm3 = vcmask 58368  }
   0x8   :  { %v27_v10 = vld [vmem:[%s467_s0 + $0x2] sm:$0xff]  ;;  %v270_v12 = vld [vmem:[%s467_s0 + $0x1a] sm:$0xff]  ;;  %vm238_vm4 = vcmask 1040384  }
   0x9   :  { %v18_v13 = vld [vmem:[%s468_s1 + $0x8] sm:$0xff]  ;;  %v17_v14 = vld [vmem:[%s468_s1] sm:$0xff]  ;;  %v264_v37 = vld [vmem:[%s467_s0 + $0x18] sm:$0xff] }
   0xa   :  { %159 = vrot.lane.b32.xlu1 %v271_v4, %s315_s19  ;;  %280 = vmatpush.msra.mxu2 %v18_v13  ;;  %v22_v16 = vld [vmem:[%s467_s0 + $0x8] sm:$0xff]  ;;  %v265_v22 = vld [vmem:[%s467_s0 + $0x20] sm:$0xff] }
   0xb   :  { %147 = vrot.lane.b32.xlu0 %v268_v5, %s316_s20  ;;  %149 = vrot.lane.b32.xlu2 %v269_v6, %s316_s20  ;;  %v266_v28 = vld [vmem:[%s467_s0 + $0x28] sm:$0x3]  ;;  %v21_v36 = vld [vmem:[%s467_s0] sm:$0xff] }
   0xc   :  { %283 = vmatpush.msra.mxu3 %v18_v13  ;;  %89 = vmatpush.msra.mxu0 %v18_v13  ;;  %v288_v45 = vld [vmem:[%s469_s2] ss:$0 sm:$0xff] }
   0xd   :  { %195 = vmatpush.msra.mxu1 %v18_v13  ;;  %281 = vmatpush.msra.mxu2 %v17_v14 }
   0xe   :  { %284 = vmatpush.msra.mxu3 %v17_v14  ;;  %90 = vmatpush.msra.mxu0 %v17_v14 }
   0xf   :  { %196 = vmatpush.msra.mxu1 %v17_v14 }
  0x12   :  { %161 = vrot.lane.b32.xlu1 %v272_v7, %s315_s19 }
  0x13   :  { %49 = vrot.lane.b32.xlu0 %v29_v8, %s315_s19  ;;  %33 = vrot.lane.b32.xlu2 %v24_v9, %s316_s20 }
  0x1a   :  { %45 = vrot.lane.b32.xlu1 %v27_v10, %s315_s19 }
  0x1b   :  { %145 = vrot.lane.b32.xlu0 %v267_v11, %s316_s20  ;;  %157 = vrot.lane.b32.xlu2 %v270_v12, %s315_s19  ;;  %s250_s20 = sshll.u32 %s471_s4, 4  ;;  %s251_s20 = int_to_ptr.hbm [resolvable:$true] %s250_s20 }
  0x5d   :  { %v38_v15 = vpop.permute.xlu2 %37 }
  0x5e   :  { %v57_v30 = vsel %vm54_vm0, %v23_v27, %v38_v15 }
  0x65   :  { %v150_v21 = vpop.permute.xlu2 %149 }
  0x66   :  { %v168_v31 = vsel %vm54_vm0, %v266_v28, %v150_v21 }
  0x6d   :  { %v34_v29 = vpop.permute.xlu2 %33 }
  0x6e   :  { %v55_v39 = vsel %vm54_vm0, %v21_v36, %v34_v29 }
  0x74   :  { %v48_v17 = vpop.permute.xlu1 %47 }
  0x75   :  { %v36_v18 = vpop.permute.xlu0 %35  ;;  %v158_v38 = vpop.permute.xlu2 %157 }
  0x76   :  { %v56_v19 = vsel %vm54_vm0, %v22_v16, %v36_v18 }
  0x77   :  { %v60_v20 = vsel %vm58_vm1, %v56_v19, %v48_v17 }
  0x78   :  { %262 = vmatmul.msk.f32.vlgmr.msra.gmra.mxu2 %vm65_vm2, %v60_v20 }
  0x7c   :  { %v160_v23 = vpop.permute.xlu1 %159 }
  0x7d   :  { %v148_v24 = vpop.permute.xlu0 %147 }
  0x7e   :  { %v167_v25 = vsel %vm54_vm0, %v265_v22, %v148_v24 }
  0x7f   :  { %v170_v26 = vsel %vm58_vm1, %v167_v25, %v160_v23 }
  0x80   :  { %274 = vmatmul.msk.f32.vlgmr.msra.gmra.mxu3 %vm65_vm2, %v170_v26 }
  0x84   :  { %v162_v32 = vpop.permute.xlu1 %161 }
  0x85   :  { %v50_v33 = vpop.permute.xlu0 %49  ;;  %v171_v35 = vsel %vm58_vm1, %v168_v31, %v162_v32 }
  0x86   :  { %v61_v34 = vsel %vm58_vm1, %v57_v30, %v50_v33 }
  0x87   :  { %263 = vmatmul.msk.f32.gmra.mxu2 %vm65_vm2, %v61_v34 }
  0x88   :  { %275 = vmatmul.msk.f32.gmra.mxu3 %vm65_vm2, %v171_v35 }
  0x8c   :  { %v46_v40 = vpop.permute.xlu1 %45 }
  0x8d   :  { %v146_v41 = vpop.permute.xlu0 %145  ;;  %v59_v43 = vsel %vm58_vm1, %v55_v39, %v46_v40 }
  0x8e   :  { %v166_v42 = vsel %vm54_vm0, %v264_v37, %v146_v41  ;;  %261 = vmatmul.msk.f32.vlgmr.msra.gmra.mxu0 %vm65_vm2, %v59_v43 }
  0x8f   :  { %v169_v44 = vsel %vm58_vm1, %v166_v42, %v158_v38 }
  0x90   :  { %273 = vmatmul.msk.f32.vlgmr.msra.gmra.mxu1 %vm65_vm2, %v169_v44 }
  0xfb   :  { %v95_v46 = vpop.f32.mrf.mxu2 }
  0xfc   :  { %v96_v47 = vadd.f32 %v288_v45, %v95_v46 }
  0xfe   :  { %102 = vst.msk [vmem:[%s470_s3 + $0x8] sm:$0xff] %vm54_vm0, %v96_v47  ;;  %v118_v50 = vmul.f32 %v96_v47, %v96_v47  ;;  %v106_v59 = vsel %vm54_vm0, %v96_v47, 0.0 }
 0x100   :  { %v121_v60 = vsel %vm54_vm0, %v118_v50, 0.0 }
 0x103   :  { %v201_v48 = vpop.f32.mrf.mxu3 }
 0x104   :  { %v202_v49 = vadd.f32 %v288_v45, %v201_v48 }
 0x106   :  { %277 = vst.msk [vmem:[%s470_s3 + $0x20] sm:$0xff] %vm54_vm0, %v202_v49  ;;  %v224_v56 = vmul.f32 %v202_v49, %v202_v49  ;;  %v212_v62 = vsel %vm54_vm0, %v202_v49, 0.0 }
 0x108   :  { %v227_v6 = vsel %vm54_vm0, %v224_v56, 0.0 }
 0x10a   :  { %v98_v51 = vpop.f32.mrf.mxu2 }
 0x10b   :  { %v99_v52 = vadd.f32 %v288_v45, %v98_v51  ;;  %v204_v53 = vpop.f32.mrf.mxu3  ;;  %v92_v55 = vpop.f32.mrf.mxu0 }
 0x10c   :  { %v205_v54 = vadd.f32 %v288_v45, %v204_v53  ;;  %v93_v57 = vadd.f32 %v288_v45, %v92_v55 }
 0x10d   :  { %104 = vst.msk [vmem:[%s470_s3 + $0x10] sm:$0x3] %vm103_vm3, %v99_v52  ;;  %v198_v58 = vpop.f32.mrf.mxu1  ;;  %v119_v63 = vmul.f32 %v99_v52, %v99_v52  ;;  %v108_v7 = vsel %vm103_vm3, %v99_v52, 0.0 }
 0x10e   :  { %278 = vst.msk [vmem:[%s470_s3 + $0x28] sm:$0x3] %vm103_vm3, %v205_v54  ;;  %v199_v61 = vadd.f32 %v288_v45, %v198_v58  ;;  %v105_v0 = vsel %vm54_vm0, %v93_v57, 0.0  ;;  %v117_v1 = vmul.f32 %v93_v57, %v93_v57  ;;  %v225_v2 = vmul.f32 %v205_v54, %v205_v54 }
 0x10f   :  { %101 = vst.msk [vmem:[%s470_s3] sm:$0xff] %vm54_vm0, %v93_v57  ;;  %v107_v3 = vadd.f32 %v106_v59, %v105_v0  ;;  %v214_v10 = vsel %vm103_vm3, %v205_v54, 0.0  ;;  %v123_v14 = vsel %vm103_vm3, %v119_v63, 0.0 }
 0x110   :  { %276 = vst.msk [vmem:[%s470_s3 + $0x18] sm:$0xff] %vm54_vm0, %v199_v61  ;;  %v211_v4 = vsel %vm54_vm0, %v199_v61, 0.0  ;;  %v223_v5 = vmul.f32 %v199_v61, %v199_v61  ;;  %v120_v8 = vsel %vm54_vm0, %v117_v1, 0.0  ;;  %v229_v17 = vsel %vm103_vm3, %v225_v2, 0.0  ;;  %s317_s3 = smov [#allocation2]  }
 0x111   :  { %v213_v9 = vadd.f32 %v212_v62, %v211_v4  ;;  %v109_v11 = vadd.f32 %v108_v7, %v107_v3  ;;  %v122_v12 = vadd.f32 %v121_v60, %v120_v8  ;;  %s248_s18 = sshll.u32 %s317_s3, 4  ;;  %s249_s18 = int_to_ptr.vmem [resolvable:$true] %s248_s18 }
 0x112   :  { %v226_v13 = vsel %vm54_vm0, %v223_v5, 0.0 }
 0x113   :  { %v215_v15 = vadd.f32 %v214_v10, %v213_v9  ;;  %v228_v16 = vadd.f32 %v227_v6, %v226_v13  ;;  %v110_v18 = vrot.slane %v109_v11, 4  ;;  %v124_v19 = vadd.f32 %v123_v14, %v122_v12 }
 0x115   :  { %v216_v20 = vrot.slane %v215_v15, 4  ;;  %v230_v21 = vadd.f32 %v229_v17, %v228_v16  ;;  %v111_v22 = vadd.f32 %v110_v18, %v109_v11  ;;  %v125_v23 = vrot.slane %v124_v19, 4 }
 0x117   :  { %v217_v24 = vadd.f32 %v216_v20, %v215_v15  ;;  %v231_v25 = vrot.slane %v230_v21, 4  ;;  %v112_v26 = vrot.slane %v111_v22, 2  ;;  %v126_v27 = vadd.f32 %v125_v23, %v124_v19 }
 0x119   :  { %v218_v28 = vrot.slane %v217_v24, 2  ;;  %v232_v29 = vadd.f32 %v231_v25, %v230_v21  ;;  %v113_v30 = vadd.f32 %v112_v26, %v111_v22  ;;  %v127_v31 = vrot.slane %v126_v27, 2 }
 0x11b   :  { %v219_v32 = vadd.f32 %v218_v28, %v217_v24  ;;  %v233_v33 = vrot.slane %v232_v29, 2  ;;  %v114_v34 = vrot.slane %v113_v30, 1  ;;  %v128_v35 = vadd.f32 %v127_v31, %v126_v27 }
 0x11d   :  { %v220_v36 = vrot.slane %v219_v32, 1  ;;  %v234_v37 = vadd.f32 %v233_v33, %v232_v29  ;;  %v129_v38 = vrot.slane %v128_v35, 1  ;;  %v115_v39 = vadd.f32 %v114_v34, %v113_v30 }
 0x11f   :  { %v221_v40 = vadd.f32 %v220_v36, %v219_v32  ;;  %v235_v41 = vrot.slane %v234_v37, 1  ;;  %v130_v42 = vadd.f32 %v129_v38, %v128_v35 }
 0x121   :  { %v236_v43 = vadd.f32 %v235_v41, %v234_v37  ;;  %v222_v44 = vadd.f32 %v221_v40, %v115_v39 }
 0x123   :  { %v237_v45 = vadd.f32 %v236_v43, %v130_v42 }
 0x125   :  { %v239_v46 = vsel %vm238_vm4, %v222_v44, %v237_v45 }
 0x126   :  { %240 = vst.msk [vmem:[#allocation2] sm:$0x3] %vm103_vm3, %v239_v46 }
 0x127   :  { %253 = dma.vmem_to_hbm [thread:$0]  %s249_s18, 32, %s251_s20, [#allocation3]  }
 0x128   :  { %313 = dma.done.wait [#allocation3], 32  }
 0x129   :  { %314 = vsyncadd [#allocation3], 4294967264 }
 0x12a   :  { %260 = vsyncpa [#allocation3], 1 }

</bundles_post_ra>
